<compile_context>
chip_gen: v5e
topology: v5e:2x2
jax: 0.10.0
libtpu: 0.0.40
codegen_flags: <defaults>
</compile_context>

<pallas_src>
import functools

import jax
import jax.numpy as jnp
from jax.experimental import pallas as pl
from jax.experimental.pallas import tpu as pltpu


# --------------------------------------------------------------------------
# helpers
# --------------------------------------------------------------------------
def _pick_tile(dim, target, min_tile=128):
    """Largest power-of-two-ish tile <= target dividing `dim`, else the full dim.

    Returning the full dim keeps the (8,128) BlockSpec rule satisfied at small /
    odd shapes ("equal the full array dim"); at real scale dims divide the target.
    """
    if dim <= target:
        return dim
    t = target
    while t >= min_tile:
        if dim % t == 0:
            return t
        t //= 2
    return dim


# --------------------------------------------------------------------------
# Tiled GEMM + bias (epilogue-fused), f32 accumulation
# --------------------------------------------------------------------------
def _matmul_bias_kernel(x_ref, w_ref, b_ref, o_ref, acc_ref, *, activation):
    k = pl.program_id(2)

    @pl.when(k == 0)
    def _():
        acc_ref[...] = jnp.zeros_like(acc_ref)

    acc_ref[...] += jnp.dot(
        x_ref[...].astype(jnp.float32),
        w_ref[...].astype(jnp.float32),
        preferred_element_type=jnp.float32,
    )

    @pl.when(k == pl.num_programs(2) - 1)
    def _():
        y = acc_ref[...] + b_ref[...].astype(jnp.float32)  # bias fused in epilogue
        if activation == "tanh":
            y = jnp.tanh(y)
        o_ref[...] = y.astype(o_ref.dtype)


def matmul_bias(x, w, b, activation="none", tm=256, tn=256, tk=512):
    """y = act(x @ w + b);  x:[M,K]  w:[K,N]  b:[N]  ->  [M,N] f32."""
    M, K = x.shape
    K2, N = w.shape
    assert K == K2
    tm = _pick_tile(M, tm)
    tn = _pick_tile(N, tn)
    tk = _pick_tile(K, tk)
    grid = (M // tm, N // tn, K // tk)
    kernel = functools.partial(_matmul_bias_kernel, activation=activation)
    return pl.pallas_call(
        kernel,
        out_shape=jax.ShapeDtypeStruct((M, N), jnp.float32),
        grid=grid,
        in_specs=[
            pl.BlockSpec((tm, tk), lambda i, j, k: (i, k)),
            pl.BlockSpec((tk, tn), lambda i, j, k: (k, j)),
            pl.BlockSpec((1, tn), lambda i, j, k: (0, j)),   # per-N-tile bias
        ],
        out_specs=pl.BlockSpec((tm, tn), lambda i, j, k: (i, j)),
        scratch_shapes=[pltpu.VMEM((tm, tn), jnp.float32)],
        compiler_params=pltpu.CompilerParams(
            dimension_semantics=("parallel", "parallel", "arbitrary")),
        cost_estimate=pl.CostEstimate(
            flops=2 * M * N * K,
            transcendentals=0,
            bytes_accessed=4 * (M * K + K * N + M * N)),
    )(x, w, b.reshape(1, N))


# --------------------------------------------------------------------------
# Row-tiled LayerNorm (last axis)
# --------------------------------------------------------------------------
def _layernorm_kernel(x_ref, g_ref, b_ref, o_ref, *, eps):
    x = x_ref[...].astype(jnp.float32)
    mean = jnp.mean(x, axis=-1, keepdims=True)
    var = jnp.mean((x - mean) ** 2, axis=-1, keepdims=True)
    xhat = (x - mean) * jax.lax.rsqrt(var + eps)
    o_ref[...] = (xhat * g_ref[...] + b_ref[...]).astype(o_ref.dtype)


def layernorm(x, gamma, beta, eps=1e-5):
    M, H = x.shape
    tm = _pick_tile(M, 512, min_tile=8)
    kernel = functools.partial(_layernorm_kernel, eps=eps)
    return pl.pallas_call(
        kernel,
        out_shape=jax.ShapeDtypeStruct((M, H), jnp.float32),
        grid=(M // tm,),
        in_specs=[
            pl.BlockSpec((tm, H), lambda i: (i, 0)),
            pl.BlockSpec((1, H), lambda i: (0, 0)),
            pl.BlockSpec((1, H), lambda i: (0, 0)),
        ],
        out_specs=pl.BlockSpec((tm, H), lambda i: (i, 0)),
        compiler_params=pltpu.CompilerParams(dimension_semantics=("parallel",)),
    )(x, gamma.reshape(1, H), beta.reshape(1, H))


# --------------------------------------------------------------------------
# LSTM recurrence over time (sequential grid), packed-sequence semantics
# --------------------------------------------------------------------------
def _lstm_step_kernel(xp_ref, whh_ref, bhh_ref, len_ref,
                      seq_ref, hfin_ref, h_sc, c_sc, *, hidden):
    t = pl.program_id(0)

    @pl.when(t == 0)
    def _():
        h_sc[...] = jnp.zeros_like(h_sc)
        c_sc[...] = jnp.zeros_like(c_sc)

    h_prev = h_sc[...]
    c_prev = c_sc[...]

    # gates = x_t @ W_ih^T + b_ih (precomputed) + h_{t-1} @ W_hh^T + b_hh
    gates = (xp_ref[0].astype(jnp.float32)
             + jnp.dot(h_prev, whh_ref[...], preferred_element_type=jnp.float32)
             + bhh_ref[...].astype(jnp.float32))                        # [B, 4H]

    i_g = jax.nn.sigmoid(gates[:, 0 * hidden:1 * hidden])
    f_g = jax.nn.sigmoid(gates[:, 1 * hidden:2 * hidden])
    g_g = jnp.tanh(gates[:, 2 * hidden:3 * hidden])
    o_g = jax.nn.sigmoid(gates[:, 3 * hidden:4 * hidden])

    c_new = f_g * c_prev + i_g * g_g
    h_new = o_g * jnp.tanh(c_new)

    # packed-sequence semantics: freeze state & zero output past each length
    valid = (len_ref[...] > t).astype(jnp.float32)                      # [B, 1]
    c_sc[...] = valid * c_new + (1.0 - valid) * c_prev
    h_sc[...] = valid * h_new + (1.0 - valid) * h_prev

    seq_ref[0] = (valid * h_new).astype(seq_ref.dtype)                  # [B, H]
    hfin_ref[...] = h_sc[...].astype(hfin_ref.dtype)                    # resident


def lstm_scan(x_proj_tm, w_hh, b_hh, lengths, hidden):
    """x_proj_tm: [S, B, 4H] time-major input projections; returns ([S,B,H], [B,H])."""
    S, B, G = x_proj_tm.shape
    assert G == 4 * hidden
    len_col = lengths.astype(jnp.int32).reshape(B, 1)
    kernel = functools.partial(_lstm_step_kernel, hidden=hidden)
    seq, h_n = pl.pallas_call(
        kernel,
        grid=(S,),
        out_shape=(jax.ShapeDtypeStruct((S, B, hidden), jnp.float32),
                   jax.ShapeDtypeStruct((B, hidden), jnp.float32)),
        in_specs=[
            pl.BlockSpec((1, B, G), lambda t: (t, 0, 0)),   # one time step / iter
            pl.BlockSpec((hidden, G), lambda t: (0, 0)),    # W_hh resident
            pl.BlockSpec((1, G), lambda t: (0, 0)),
            pl.BlockSpec((B, 1), lambda t: (0, 0)),
        ],
        out_specs=(pl.BlockSpec((1, B, hidden), lambda t: (t, 0, 0)),
                   pl.BlockSpec((B, hidden), lambda t: (0, 0))),
        scratch_shapes=[pltpu.VMEM((B, hidden), jnp.float32),   # h state
                        pltpu.VMEM((B, hidden), jnp.float32)],  # c state
        compiler_params=pltpu.CompilerParams(
            dimension_semantics=("arbitrary",)),               # sequential carry
    )(x_proj_tm, w_hh, b_hh.reshape(1, G), len_col)
    return seq, h_n


# --------------------------------------------------------------------------
# Parameter init (deterministic, synthetic; PyTorch-style uniform ranges)
# --------------------------------------------------------------------------
def init_params(key, input_size, hidden_size, output_size):
    ks = jax.random.split(key, 8)
    s_lstm = 1.0 / (hidden_size ** 0.5)
    s_lin = 1.0 / (hidden_size ** 0.5)

    def unif(k, shape, s):
        return jax.random.uniform(k, shape, jnp.float32, -s, s)

    return {
        # LSTM (gate order i, f, g, o), stored transposed for x @ W
        "w_ih": unif(ks[0], (input_size, 4 * hidden_size), s_lstm),
        "b_ih": unif(ks[1], (4 * hidden_size,), s_lstm),
        "w_hh": unif(ks[2], (hidden_size, 4 * hidden_size), s_lstm),
        "b_hh": unif(ks[3], (4 * hidden_size,), s_lstm),
        # LayerNorm
        "ln_g": jnp.ones((hidden_size,), jnp.float32),
        "ln_b": jnp.zeros((hidden_size,), jnp.float32),
        # linear_1 (embedding head), linear_2 (sequence head)
        "w1": unif(ks[4], (hidden_size, output_size), s_lin),
        "b1": unif(ks[5], (output_size,), s_lin),
        "w2": unif(ks[6], (hidden_size, output_size), s_lin),
        "b2": unif(ks[7], (output_size,), s_lin),
    }


# --------------------------------------------------------------------------
# RNNME.forward equivalent (unidirectional, 1 layer, inference)
# --------------------------------------------------------------------------
def rnn_me_forward(params, x, mask, lengths):
    # `mask` is unused by the PyTorch module ("不具备实际含义") — accepted and ignored.
    del mask
    B, S, I = x.shape
    H = params["w_hh"].shape[0]

    # ---- input projection for all time steps in one tiled GEMM (time-major) ----
    x_tm = x.transpose(1, 0, 2).reshape(S * B, I).astype(jnp.float32)
    x_proj = matmul_bias(x_tm, params["w_ih"], params["b_ih"]).reshape(S, B, 4 * H)

    # ---- sequential LSTM recurrence with length masking (= pack/pad semantics) ----
    seq_tm, h_n = lstm_scan(x_proj, params["w_hh"], params["b_hh"], lengths, H)

    # ---- LayerNorm over hidden dim (applied to zero-padded steps too, as in torch) ----
    seq_ln = layernorm(seq_tm.reshape(S * B, H), params["ln_g"], params["ln_b"])

    # TODO(synk): Dropout is identity here (inference/eval mode).
    # TODO(synk): bidirectional=True / number_layers>1 variants not implemented
    #             (module defaults are unidirectional, 1 layer).

    # ---- heads ----
    emb = matmul_bias(h_n, params["w1"], params["b1"])                 # linear_1(h_n)
    seq_out = matmul_bias(seq_ln, params["w2"], params["b2"])          # linear_2(LN(out))
    seq_out = seq_out.reshape(S, B, -1).transpose(1, 0, 2)             # -> [B, S, O]

    return {"sequence": seq_out, "embedding": emb}


# --------------------------------------------------------------------------
if __name__ == "__main__":
    input_size, hidden_size, output_size = 16, 32, 24
    B, S = 2, 8

    key = jax.random.PRNGKey(0)
    k_param, k_x = jax.random.split(key, 2)

    params = init_params(k_param, input_size, hidden_size, output_size)

    x = jax.random.normal(k_x, (B, S, input_size), jnp.float32)
    lengths = jnp.array([S, 5], dtype=jnp.int32)          # second sequence padded
    mask = (jnp.arange(S)[None, :] < lengths[:, None]).astype(jnp.int32)
    # zero the padded tail of x, mimicking a padded batch
    x = x * mask[:, :, None].astype(jnp.float32)

    out = rnn_me_forward(params, x, mask, lengths)
    jax.block_until_ready(out["sequence"])
    jax.block_until_ready(out["embedding"])

    assert out["sequence"].shape == (B, S, output_size)
    assert out["embedding"].shape == (B, output_size)
    print("KERNEL_OK")
</pallas_src>

<mosaic_0001>
module attributes {stable_mosaic.version = 11 : i64} {
  func.func @_matmul_bias_kernel(%arg0: i32, %arg1: i32, %arg2: i32, %arg3: memref<16x16xf32, #tpu.memory_space<vmem>>, %arg4: memref<16x128xf32, #tpu.memory_space<vmem>>, %arg5: memref<1x128xf32, #tpu.memory_space<vmem>>, %arg6: memref<16x128xf32, #tpu.memory_space<vmem>>, %arg7: memref<16x128xf32, #tpu.memory_space<vmem>>) attributes {dimension_semantics = [#tpu.dimension_semantics<parallel>, #tpu.dimension_semantics<parallel>, #tpu.dimension_semantics<arbitrary>], iteration_bounds = array<i64: 1, 1, 1>, scalar_prefetch = 0 : i64, scratch_operands = 1 : i64, tpu.core_type = #tpu.core_type<tc>, window_params = [{transform_indices = @transform_0, window_bounds = array<i64: 16, 16>}, {transform_indices = @transform_1, window_bounds = array<i64: 16, 128>}, {transform_indices = @transform_2, window_bounds = array<i64: 1, 128>}, {transform_indices = @transform_3, window_bounds = array<i64: 16, 128>}]} {
    %c0_i32 = arith.constant 0 : i32
    %0 = arith.cmpi eq, %arg2, %c0_i32 : i32
    %1 = arith.extui %0 : i1 to i32
    %c0_i32_0 = arith.constant 0 : i32
    %2 = arith.cmpi ne, %1, %c0_i32_0 : i32
    scf.if %2 {
      %cst_10 = arith.constant 0.000000e+00 : f32
      %12 = vector.broadcast %cst_10 : f32 to vector<16x128xf32>
      %c0_11 = arith.constant 0 : index
      %c0_12 = arith.constant 0 : index
      %13 = vector.load %arg7[%c0_11, %c0_12] : memref<16x128xf32, #tpu.memory_space<vmem>>, vector<16x128xf32>
      tpu.vector_store %arg7[%c0_11, %c0_12], %12 {strides = array<i32>} : memref<16x128xf32, #tpu.memory_space<vmem>>, vector<16x128xf32>,
    } else {
    }
    %c0 = arith.constant 0 : index
    %c0_1 = arith.constant 0 : index
    %3 = vector.load %arg7[%c0, %c0_1] : memref<16x128xf32, #tpu.memory_space<vmem>>, vector<16x128xf32>
    %c0_2 = arith.constant 0 : index
    %c0_3 = arith.constant 0 : index
    %4 = vector.load %arg3[%c0_2, %c0_3] : memref<16x16xf32, #tpu.memory_space<vmem>>, vector<16x16xf32>
    %c0_4 = arith.constant 0 : index
    %c0_5 = arith.constant 0 : index
    %5 = vector.load %arg4[%c0_4, %c0_5] : memref<16x128xf32, #tpu.memory_space<vmem>>, vector<16x128xf32>
    %cst = arith.constant dense<0.000000e+00> : vector<16x128xf32>
    %6 = tpu.matmul %4, %5, %cst {dimension_numbers = #tpu.dot_dimension_numbers<[1], [0], [0], [1], [0, 0, 1, 1], [], []>} : vector<16x16xf32>, vector<16x128xf32>, vector<16x128xf32> -> vector<16x128xf32>
    %7 = arith.addf %3, %6 : vector<16x128xf32>
    %c0_6 = arith.constant 0 : index
    %c0_7 = arith.constant 0 : index
    %8 = vector.load %arg7[%c0_6, %c0_7] : memref<16x128xf32, #tpu.memory_space<vmem>>, vector<16x128xf32>
    tpu.vector_store %arg7[%c0_6, %c0_7], %7 {strides = array<i32>} : memref<16x128xf32, #tpu.memory_space<vmem>>, vector<16x128xf32>,
    %c0_i32_8 = arith.constant 0 : i32
    %9 = arith.cmpi eq, %arg2, %c0_i32_8 : i32
    %10 = arith.extui %9 : i1 to i32
    %c0_i32_9 = arith.constant 0 : i32
    %11 = arith.cmpi ne, %10, %c0_i32_9 : i32
    scf.if %11 {
      %c0_10 = arith.constant 0 : index
      %c0_11 = arith.constant 0 : index
      %12 = vector.load %arg7[%c0_10, %c0_11] : memref<16x128xf32, #tpu.memory_space<vmem>>, vector<16x128xf32>
      %c0_12 = arith.constant 0 : index
      %c0_13 = arith.constant 0 : index
      %13 = vector.load %arg5[%c0_12, %c0_13] : memref<1x128xf32, #tpu.memory_space<vmem>>, vector<1x128xf32>
      %14 = vector.broadcast %13 : vector<1x128xf32> to vector<16x128xf32>
      %15 = arith.addf %12, %14 : vector<16x128xf32>
      %c0_14 = arith.constant 0 : index
      %c0_15 = arith.constant 0 : index
      %16 = vector.load %arg6[%c0_14, %c0_15] : memref<16x128xf32, #tpu.memory_space<vmem>>, vector<16x128xf32>
      tpu.vector_store %arg6[%c0_14, %c0_15], %15 {strides = array<i32>} : memref<16x128xf32, #tpu.memory_space<vmem>>, vector<16x128xf32>,
    } else {
    }
    return
  }
  func.func @transform_0(%arg0: i32, %arg1: i32, %arg2: i32) -> (i32, i32) {
    %c0_i32 = arith.constant 0 : i32
    return %arg0, %arg2 : i32, i32
  }
  func.func @transform_1(%arg0: i32, %arg1: i32, %arg2: i32) -> (i32, i32) {
    %c0_i32 = arith.constant 0 : i32
    return %arg2, %arg1 : i32, i32
  }
  func.func @transform_2(%arg0: i32, %arg1: i32, %arg2: i32) -> (i32, i32) {
    %c0_i32 = arith.constant 0 : i32
    %c0_i32_0 = arith.constant 0 : i32
    return %c0_i32, %arg1 : i32, i32
  }
  func.func @transform_3(%arg0: i32, %arg1: i32, %arg2: i32) -> (i32, i32) {
    %c0_i32 = arith.constant 0 : i32
    return %arg0, %arg1 : i32, i32
  }
}

</mosaic_0001>

<bundles_post_ra>
// kernel: tpu_custom_call.1
= control target key start
LH: loop header
LB: loop body
LE: loop exit
PB: predicated region body
PF: predicated region fallthrough
CT: control target
= control target key end

     0   :  { %8 = vsyncpa [#allocation4], 0  ;;  %s260_s0 = inlined_call_operand.hbm [shape: f32[16,16], index: 0, kind: input, shape index: {}]   ;;  %s261_s1 = inlined_call_operand.hbm [shape: f32[16,128], index: 1, kind: input, shape index: {}]   ;;  %s262_s2 = inlined_call_operand.vmem [shape: f32[1,128], index: 2, kind: input, shape index: {}]   ;;  %s263_s3 = inlined_call_operand.hbm [shape: f32[16,128], index: 3, kind: output, shape index: {}]  }
   0x1   :  { %9 = vsyncpa [#allocation7], 0 }
   0x2   :  { %10 = vsyncpa [#allocation5], 0  ;;  %s15_s14 = sshll.u32 %s260_s0, 4  ;;  %s214_s15 = smov [#allocation3]   ;;  %s16_s14 = int_to_ptr.hbm [resolvable:$true] %s15_s14 }
   0x3   :  { %s17_s16 = sshll.u32 %s214_s15, 4  ;;  %s28_s19 = sshll.u32 %s261_s1, 4  ;;  %s18_s16 = int_to_ptr.vmem [resolvable:$true] %s17_s16  ;;  %s29_s19 = int_to_ptr.hbm [resolvable:$true] %s28_s19 }
   0x4   :  { %s215_s20 = smov 128   ;;  %s216_s21 = smov 8  }
   0x5   :  { %23 = dma.hbm_to_vmem [thread:$0]  %s16_s14, 256, %s18_s16, [#allocation4], %s215_s20, %s215_s20, %s216_s21  }
   0x6   :  { %s217_s22 = smov [#allocation6]  }
   0x7   :  { %s30_s23 = sshll.u32 %s217_s22, 4  ;;  %s31_s23 = int_to_ptr.vmem [resolvable:$true] %s30_s23 }
   0x8   :  { %36 = dma.hbm_to_vmem [thread:$0]  %s29_s19, 256, %s31_s23, [#allocation7], %s215_s20, %s215_s20, %s216_s21  }
   0x9   :  { %208 = dma.done.wait [#allocation4], 256  }
   0xa   :  { %209 = vsyncadd [#allocation4], 4294967040 }
   0xb   :  { %210 = dma.done.wait [#allocation7], 256  }
   0xc   :  { %211 = vsyncadd [#allocation7], 4294967040  ;;  %v58_v0 = vld [vmem:[#allocation6 + $0x8] sm:$0xff]  ;;  %v57_v1 = vld [vmem:[#allocation6] sm:$0xff]  ;;  %vm59_vm0 = vcmask 130048   ;;  %s218_s24 = smov [#allocation8]  }
   0xd   :  { %80 = vmatpush.msra.mxu0 %v58_v0  ;;  %128 = vmatpush.msra.mxu1 %v58_v0  ;;  %v55_v2 = vld [vmem:[#allocation3] sm:$0xff]  ;;  %v56_v3 = vld [vmem:[#allocation3 + $0x8] sm:$0xff]  ;;  %s110_s25 = sshll.u32 %s218_s24, 4  ;;  %s112_s28 = sshll.u32 %s263_s3, 4  ;;  %s111_s25 = int_to_ptr.vmem [resolvable:$true] %s110_s25  ;;  %s113_s28 = int_to_ptr.hbm [resolvable:$true] %s112_s28 }
   0xe   :  { %v135_v4 = vld [vmem:[%s262_s2] ss:$0 sm:$0xff] }
   0xf   :  { %81 = vmatpush.msra.mxu0 %v57_v1  ;;  %129 = vmatpush.msra.mxu1 %v57_v1 }
  0x10   :  { %126 = vmatmul.msk.f32.vlgmr.msra.gmra.mxu0 %vm59_vm0, %v55_v2  ;;  %127 = vmatmul.msk.f32.vlgmr.msra.gmra.mxu1 %vm59_vm0, %v56_v3 }
  0x8d   :  { %v83_v5 = vpop.f32.mrf.mxu0  ;;  %v86_v6 = vpop.f32.mrf.mxu1 }
  0x8e   :  { %v102_v7 = vadd.f32 %v135_v4, %v83_v5  ;;  %v103_v8 = vadd.f32 %v135_v4, %v86_v6 }
  0x90   :  { %104 = vst [vmem:[#allocation8] sm:$0xff] %v102_v7 }
  0x91   :  { %105 = vst [vmem:[#allocation8 + $0x8] sm:$0xff] %v103_v8 }
  0x92   :  { %118 = dma.vmem_to_hbm [thread:$0]  %s111_s25, 256, %s113_s28, [#allocation5], %s215_s20, %s215_s20, %s216_s21  }
  0x93   :  { %212 = dma.done.wait [#allocation5], 256  }
  0x94   :  { %213 = vsyncadd [#allocation5], 4294967040 }
  0x95   :  { %123 = vsyncpa [#allocation4], 1 }
  0x96   :  { %124 = vsyncpa [#allocation7], 1 }
  0x97   :  { %125 = vsyncpa [#allocation5], 1 }

</bundles_post_ra>
